<compile_context>
chip_gen: v7x
topology: tpu7x:2x2x1
jax: 0.10.0
libtpu: 0.0.40
codegen_flags: <defaults>
</compile_context>

<pallas_src>
import math
from functools import partial

import jax
import jax.numpy as jnp
from jax import lax
from jax.experimental import pallas as pl
from jax.experimental.pallas import tpu as pltpu

NEG_SLOPE = 0.01                    # nn.LeakyReLU() default
BN_EPS = 1e-5                       # nn.BatchNorm2d default
TM_TARGET = 2048                    # rows (pixels) per tile target
VMEM_BUDGET = 28 * 1024 * 1024      # per-step double-buffered budget (v7x-safe)


def _round_up(a, b):
    return (a + b - 1) // b * b


def _choose_row_tile(M, K, Cp, in_bytes, out_bytes=4,
                     tm_target=TM_TARGET, vmem_budget=VMEM_BUDGET):
    """Divisor-style row tile sized against a per-generation-safe VMEM budget."""
    fixed = 2 * K * Cp * in_bytes + 4 * 8 * Cp * out_bytes          # weight + stats/scale/shift
    per_row = 2 * (K * in_bytes + Cp * out_bytes)                   # xp tile + f32 out tile (dbl-buf)
    tm_cap = max(8, (max(vmem_budget - fixed, 0) // per_row) // 8 * 8)
    tm = max(8, min(tm_target, tm_cap, _round_up(M, 8)))
    g = pl.cdiv(M, tm)
    tm = _round_up(pl.cdiv(M, g), 8)                                # padding < 8 rows per tile
    return tm, g


def _stats_kernel(xp_ref, w_ref, stats_ref):
    """LeakyReLU + fused block-diagonal 1x1-conv matmul -> per-tile BN partials only."""
    a = xp_ref[...]
    a = jnp.where(a >= 0, a, NEG_SLOPE * a)        # exact: 1x1/stride-2 only reads these pixels
    y = jnp.dot(a, w_ref[...], preferred_element_type=jnp.float32)   # (TM, Cp) f32 accum
    stats_ref[0:1, :] = jnp.sum(y, axis=0, keepdims=True)            # per-tile sum
    stats_ref[1:2, :] = jnp.sum(y * y, axis=0, keepdims=True)        # per-tile sumsq (rows 2..7 unused)


def _normalize_kernel(xp_ref, w_ref, scale_ref, shift_ref, o_ref):
    """Recompute y (MXU has slack; avoids the f32 intermediate) + BN folded into one FMA."""
    a = xp_ref[...]
    a = jnp.where(a >= 0, a, NEG_SLOPE * a)
    y = jnp.dot(a, w_ref[...], preferred_element_type=jnp.float32)
    o_ref[...] = y * scale_ref[...] + shift_ref[...]


def factorized_reduce(x_nchw, w1, w2, gamma, beta, *,
                      mxu_dtype=jnp.bfloat16, return_nhwc=False):
    """x_nchw: (N, Cin, H, W) f32, even H/W.  w1, w2: (Cin, Ch).  Returns (N, 2*Ch, H//2, W//2).

    mxu_dtype=bfloat16 (default) halves input HBM traffic; matmul accumulation and all
    BN math stay f32.  Use mxu_dtype=float32 for bit-closer-to-PyTorch numerics.
    """
    N, Cin, H, W = x_nchw.shape
    assert H % 2 == 0 and W % 2 == 0, "even spatial dims required (matches PyTorch concat)"
    Ho, Wo = H // 2, W // 2
    Ch = w1.shape[1]
    Cout = 2 * Ch
    M = N * Ho * Wo

    Cp = _round_up(Cout, 128)        # lane-dense; do NOT round past 128 (would inflate HBM writes)
    K = 2 * Cin                      # packed contraction dim
    in_bytes = jnp.dtype(mxu_dtype).itemsize
    TM, G = _choose_row_tile(M, K, Cp, in_bytes)
    M_pad = TM * G

    # vmem limit from actual tile sizes (v7x: don't assume 128 MiB physical VMEM).
    footprint = (2 * TM * K * in_bytes + 2 * K * Cp * in_bytes
                 + 2 * TM * Cp * 4 + 4 * 8 * Cp * 4)
    vmem_limit = int(min(60 * 1024 * 1024, max(32 * 1024 * 1024, footprint * 3 // 2)))

    # ---- glue: cast to bf16 FIRST (halves glue traffic), then pack both stride-2 grids
    #      into one (M, 2*Cin) slab [a1 | a2] with channels on the lane axis.
    # TODO(synk): if the producer can supply NHWC activations this pack becomes a cheap
    #             slice/reshape; audit the HLO to confirm it stays a single fusion.
    x_q = x_nchw.astype(mxu_dtype)
    x_nhwc = jnp.transpose(x_q, (0, 2, 3, 1))                        # (N, H, W, Cin)
    x_r = x_nhwc.reshape(N, Ho, 2, Wo, 2, Cin)
    p1 = x_r[:, :, 0, :, 0, :]                                       # x[:, :, 0::2, 0::2]
    p2 = x_r[:, :, 1, :, 1, :]                                       # x[:, :, 1::2, 1::2]
    xp = jnp.concatenate([p1, p2], axis=-1).reshape(M, K)
    if M_pad > M:
        xp = jnp.pad(xp, ((0, M_pad - M), (0, 0)))                   # zero rows: no effect on stats

    # ---- block-diagonal weight: one matmul == [conv1 | conv2], zero pad to Cp lanes ----
    w_packed = jnp.zeros((K, Cp), dtype=mxu_dtype)
    w_packed = w_packed.at[:Cin, :Ch].set(w1.astype(mxu_dtype))
    w_packed = w_packed.at[Cin:, Ch:Cout].set(w2.astype(mxu_dtype))

    # Grid-invariant weight block; drop the dead double buffer only when it is big
    # (matters on v7x's 64 MiB VMEM, negligible otherwise).
    if 2 * K * Cp * in_bytes > (2 << 20):
        w_spec = pl.BlockSpec((K, Cp), lambda i: (0, 0), pipeline_mode=pl.Buffered(1))
    else:
        w_spec = pl.BlockSpec((K, Cp), lambda i: (0, 0))
    # TODO(synk): for very large Cin/Cout add an output-channel grid axis (tile Cp) so the
    #             weight and output tiles shrink instead of only capping TM.

    # ---- pass 1: activation + fused matmul -> per-tile sum/sumsq partials only ----
    stats = pl.pallas_call(
        _stats_kernel,
        out_shape=jax.ShapeDtypeStruct((G * 8, Cp), jnp.float32),
        grid_spec=pltpu.PrefetchScalarGridSpec(
            num_scalar_prefetch=0,
            grid=(G,),
            in_specs=[pl.BlockSpec((TM, K), lambda i: (i, 0)), w_spec],
            out_specs=pl.BlockSpec((8, Cp), lambda i: (i, 0))),
        compiler_params=pltpu.CompilerParams(
            dimension_semantics=("parallel",),        # disjoint stats blocks keep this shardable (v7x 2 TCs)
            vmem_limit_bytes=vmem_limit),
    )(xp, w_packed)

    # ---- tiny global-stats finalize + BN fold into scale/shift (O(Cp) work) ----
    # TODO(synk): nn.BatchNorm2d also updates running_mean/running_var in training mode;
    #             those buffer side effects are not produced here.
    # NOTE: E[y^2]-E[y]^2 in f32 can cancel when |mean| >> std; fine for near-zero-mean conv
    #       outputs — switch to per-tile centered (Chan) partials if that regime matters.
    stats = stats.reshape(G, 8, Cp)
    sum_y = jnp.sum(stats[:, 0, :], axis=0)
    sum_sq = jnp.sum(stats[:, 1, :], axis=0)
    mean = sum_y / M                                                  # true M: pad rows are zero
    var = jnp.maximum(sum_sq / M - mean * mean, 0.0)
    gamma_p = jnp.zeros((Cp,), jnp.float32).at[:Cout].set(gamma.astype(jnp.float32))
    beta_p = jnp.zeros((Cp,), jnp.float32).at[:Cout].set(beta.astype(jnp.float32))
    scale = (gamma_p * lax.rsqrt(var + BN_EPS)).reshape(1, Cp)
    shift = (beta_p.reshape(1, Cp) - mean.reshape(1, Cp) * scale)

    # ---- pass 2: recompute y + single FMA normalize, write final values ----
    out_flat = pl.pallas_call(
        _normalize_kernel,
        out_shape=jax.ShapeDtypeStruct((M_pad, Cp), jnp.float32),
        grid_spec=pltpu.PrefetchScalarGridSpec(
            num_scalar_prefetch=0,
            grid=(G,),
            in_specs=[pl.BlockSpec((TM, K), lambda i: (i, 0)),
                      w_spec,
                      pl.BlockSpec((1, Cp), lambda i: (0, 0)),
                      pl.BlockSpec((1, Cp), lambda i: (0, 0))],
            out_specs=pl.BlockSpec((TM, Cp), lambda i: (i, 0))),
        compiler_params=pltpu.CompilerParams(
            dimension_semantics=("parallel",),
            vmem_limit_bytes=vmem_limit),
    )(xp, w_packed, scale, shift)

    # ---- glue: drop row/channel pads; transpose back to NCHW only if required ----
    out = out_flat[:M, :Cout].reshape(N, Ho, Wo, Cout)
    if return_nhwc:
        return out
    return jnp.transpose(out, (0, 3, 1, 2))


if __name__ == "__main__":
    key = jax.random.PRNGKey(0)
    k_x, k_w1, k_w2 = jax.random.split(key, 3)

    N, Cin, H, W = 2, 4, 16, 16
    out_channels = 8
    Ch = math.floor(out_channels / 2)

    x = jax.random.normal(k_x, (N, Cin, H, W), dtype=jnp.float32)

    # PyTorch Conv2d weight is (Ch, Cin, 1, 1); stored here as (Cin, Ch) == weight.reshape(Ch, Cin).T
    w1 = jax.random.normal(k_w1, (Cin, Ch), dtype=jnp.float32) * 0.1
    w2 = jax.random.normal(k_w2, (Cin, Ch), dtype=jnp.float32) * 0.1

    # BatchNorm2d(affine=True) default init: gamma = 1, beta = 0.
    gamma = jnp.ones((out_channels,), dtype=jnp.float32)
    beta = jnp.zeros((out_channels,), dtype=jnp.float32)

    fr = jax.jit(factorized_reduce)
    out = fr(x, w1, w2, gamma, beta)
    jax.block_until_ready(out)
    assert out.shape == (N, out_channels, H // 2, W // 2)

    # ---- tight check: reference mirrors the kernel's bf16 input quantization
    #      (f32 accumulation / BN math in both), so tolerances stay tight. ----
    x_q = x.astype(jnp.bfloat16)
    a_q = jnp.where(x_q >= 0, x_q, NEG_SLOPE * x_q).astype(jnp.float32)
    w1_q = w1.astype(jnp.bfloat16).astype(jnp.float32)
    w2_q = w2.astype(jnp.bfloat16).astype(jnp.float32)
    y1 = jnp.einsum('nchw,cd->ndhw', a_q[:, :, 0::2, 0::2], w1_q)
    y2 = jnp.einsum('nchw,cd->ndhw', a_q[:, :, 1::2, 1::2], w2_q)
    yq = jnp.concatenate([y1, y2], axis=1)
    mq = jnp.mean(yq, axis=(0, 2, 3), keepdims=True)
    vq = jnp.mean((yq - mq) ** 2, axis=(0, 2, 3), keepdims=True)
    ref_q = (yq - mq) * lax.rsqrt(vq + BN_EPS) * gamma.reshape(1, -1, 1, 1) + beta.reshape(1, -1, 1, 1)
    err_q = float(jnp.max(jnp.abs(out - ref_q)))
    assert jnp.allclose(out, ref_q, atol=2e-3, rtol=2e-3), f"max abs err vs bf16-quantized ref {err_q}"

    # ---- loose check: pure-f32 PyTorch-semantics reference; slack documents the
    #      bf16 input-quantization error (inputs are bf16 on the MXU by default). ----
    a = jnp.where(x >= 0, x, NEG_SLOPE * x)
    y1 = jnp.einsum('nchw,cd->ndhw', a[:, :, 0::2, 0::2], w1)
    y2 = jnp.einsum('nchw,cd->ndhw', a[:, :, 1::2, 1::2], w2)
    y = jnp.concatenate([y1, y2], axis=1)
    mean = jnp.mean(y, axis=(0, 2, 3), keepdims=True)
    var = jnp.mean((y - mean) ** 2, axis=(0, 2, 3), keepdims=True)
    ref = (y - mean) * lax.rsqrt(var + BN_EPS) * gamma.reshape(1, -1, 1, 1) + beta.reshape(1, -1, 1, 1)
    err = float(jnp.max(jnp.abs(out - ref)))
    assert jnp.allclose(out, ref, atol=5e-2, rtol=5e-2), f"max abs err vs f32 ref {err}"

    print("KERNEL_OK")
</pallas_src>

<mosaic_0001>
module attributes {stable_mosaic.version = 11 : i64} {
  func.func @_stats_kernel(%arg0: i32, %arg1: memref<128x8xbf16, #tpu.memory_space<vmem>>, %arg2: memref<8x128xbf16, #tpu.memory_space<vmem>>, %arg3: memref<8x128xf32, #tpu.memory_space<vmem>>) attributes {dimension_semantics = [#tpu.dimension_semantics<parallel>], iteration_bounds = array<i64: 1>, scalar_prefetch = 0 : i64, scratch_operands = 0 : i64, tpu.core_type = #tpu.core_type<tc>, window_params = [{transform_indices = @transform_0, window_bounds = array<i64: 128, 8>}, {pipeline_mode = #tpu.pipeline_mode<synchronous>, transform_indices = @transform_1, window_bounds = array<i64: 8, 128>}, {transform_indices = @transform_2, window_bounds = array<i64: 8, 128>}]} {
    %c0 = arith.constant 0 : index
    %c0_0 = arith.constant 0 : index
    %0 = vector.load %arg1[%c0, %c0_0] : memref<128x8xbf16, #tpu.memory_space<vmem>>, vector<128x8xbf16>
    %cst = arith.constant 0.000000e+00 : bf16
    %1 = vector.broadcast %cst : bf16 to vector<128x8xbf16>
    %2 = arith.cmpf oge, %0, %1 : vector<128x8xbf16>
    %cst_1 = arith.constant 1.000980e-02 : bf16
    %3 = vector.broadcast %cst_1 : bf16 to vector<128x8xbf16>
    %4 = arith.mulf %3, %0 : vector<128x8xbf16>
    %5 = arith.select %2, %0, %4 : vector<128x8xi1>, vector<128x8xbf16>
    %c0_2 = arith.constant 0 : index
    %c0_3 = arith.constant 0 : index
    %6 = vector.load %arg2[%c0_2, %c0_3] : memref<8x128xbf16, #tpu.memory_space<vmem>>, vector<8x128xbf16>
    %cst_4 = arith.constant dense<0.000000e+00> : vector<128x128xf32>
    %7 = tpu.matmul %5, %6, %cst_4 {dimension_numbers = #tpu.dot_dimension_numbers<[1], [0], [0], [1], [0, 0, 1, 1], [], []>} : vector<128x8xbf16>, vector<8x128xbf16>, vector<128x128xf32> -> vector<128x128xf32>
    %cst_5 = arith.constant dense<0.000000e+00> : vector<128xf32>
    %8 = vector.multi_reduction <add>, %7, %cst_5 [0] : vector<128x128xf32> to vector<128xf32>
    %9 = vector.shape_cast %8 : vector<128xf32> to vector<1x128xf32>
    %c0_6 = arith.constant 0 : index
    %c0_7 = arith.constant 0 : index
    %10 = vector.load %arg3[%c0_6, %c0_7] : memref<8x128xf32, #tpu.memory_space<vmem>>, vector<1x128xf32>
    tpu.vector_store %arg3[%c0_6, %c0_7], %9 {strides = array<i32>} : memref<8x128xf32, #tpu.memory_space<vmem>>, vector<1x128xf32>,
    %11 = arith.mulf %7, %7 : vector<128x128xf32>
    %cst_8 = arith.constant dense<0.000000e+00> : vector<128xf32>
    %12 = vector.multi_reduction <add>, %11, %cst_8 [0] : vector<128x128xf32> to vector<128xf32>
    %13 = vector.shape_cast %12 : vector<128xf32> to vector<1x128xf32>
    %c1 = arith.constant 1 : index
    %c0_9 = arith.constant 0 : index
    %14 = vector.load %arg3[%c1, %c0_9] : memref<8x128xf32, #tpu.memory_space<vmem>>, vector<1x128xf32>
    tpu.vector_store %arg3[%c1, %c0_9], %13 {strides = array<i32>} : memref<8x128xf32, #tpu.memory_space<vmem>>, vector<1x128xf32>,
    return
  }
  func.func @transform_0(%arg0: i32) -> (i32, i32) {
    %c0_i32 = arith.constant 0 : i32
    %c0_i32_0 = arith.constant 0 : i32
    return %arg0, %c0_i32 : i32, i32
  }
  func.func @transform_1(%arg0: i32) -> (i32, i32) {
    %c0_i32 = arith.constant 0 : i32
    %c0_i32_0 = arith.constant 0 : i32
    %c0_i32_1 = arith.constant 0 : i32
    return %c0_i32, %c0_i32_0 : i32, i32
  }
  func.func @transform_2(%arg0: i32) -> (i32, i32) {
    %c0_i32 = arith.constant 0 : i32
    %c0_i32_0 = arith.constant 0 : i32
    return %arg0, %c0_i32 : i32, i32
  }
}

module attributes {stable_mosaic.version = 11 : i64} {
  func.func @_normalize_kernel(%arg0: i32, %arg1: memref<128x8xbf16, #tpu.memory_space<vmem>>, %arg2: memref<8x128xbf16, #tpu.memory_space<vmem>>, %arg3: memref<1x128xf32, #tpu.memory_space<vmem>>, %arg4: memref<1x128xf32, #tpu.memory_space<vmem>>, %arg5: memref<128x128xf32, #tpu.memory_space<vmem>>) attributes {dimension_semantics = [#tpu.dimension_semantics<parallel>], iteration_bounds = array<i64: 1>, scalar_prefetch = 0 : i64, scratch_operands = 0 : i64, tpu.core_type = #tpu.core_type<tc>, window_params = [{transform_indices = @transform_0, window_bounds = array<i64: 128, 8>}, {pipeline_mode = #tpu.pipeline_mode<synchronous>, transform_indices = @transform_1, window_bounds = array<i64: 8, 128>}, {pipeline_mode = #tpu.pipeline_mode<synchronous>, transform_indices = @transform_2, window_bounds = array<i64: 1, 128>}, {pipeline_mode = #tpu.pipeline_mode<synchronous>, transform_indices = @transform_3, window_bounds = array<i64: 1, 128>}, {transform_indices = @transform_4, window_bounds = array<i64: 128, 128>}]} {
    %c0 = arith.constant 0 : index
    %c0_0 = arith.constant 0 : index
    %0 = vector.load %arg1[%c0, %c0_0] : memref<128x8xbf16, #tpu.memory_space<vmem>>, vector<128x8xbf16>
    %cst = arith.constant 0.000000e+00 : bf16
    %1 = vector.broadcast %cst : bf16 to vector<128x8xbf16>
    %2 = arith.cmpf oge, %0, %1 : vector<128x8xbf16>
    %cst_1 = arith.constant 1.000980e-02 : bf16
    %3 = vector.broadcast %cst_1 : bf16 to vector<128x8xbf16>
    %4 = arith.mulf %3, %0 : vector<128x8xbf16>
    %5 = arith.select %2, %0, %4 : vector<128x8xi1>, vector<128x8xbf16>
    %c0_2 = arith.constant 0 : index
    %c0_3 = arith.constant 0 : index
    %6 = vector.load %arg2[%c0_2, %c0_3] : memref<8x128xbf16, #tpu.memory_space<vmem>>, vector<8x128xbf16>
    %cst_4 = arith.constant dense<0.000000e+00> : vector<128x128xf32>
    %7 = tpu.matmul %5, %6, %cst_4 {dimension_numbers = #tpu.dot_dimension_numbers<[1], [0], [0], [1], [0, 0, 1, 1], [], []>} : vector<128x8xbf16>, vector<8x128xbf16>, vector<128x128xf32> -> vector<128x128xf32>
    %c0_5 = arith.constant 0 : index
    %c0_6 = arith.constant 0 : index
    %8 = vector.load %arg3[%c0_5, %c0_6] : memref<1x128xf32, #tpu.memory_space<vmem>>, vector<1x128xf32>
    %9 = vector.broadcast %8 : vector<1x128xf32> to vector<128x128xf32>
    %10 = arith.mulf %7, %9 : vector<128x128xf32>
    %c0_7 = arith.constant 0 : index
    %c0_8 = arith.constant 0 : index
    %11 = vector.load %arg4[%c0_7, %c0_8] : memref<1x128xf32, #tpu.memory_space<vmem>>, vector<1x128xf32>
    %12 = vector.broadcast %11 : vector<1x128xf32> to vector<128x128xf32>
    %13 = arith.addf %10, %12 : vector<128x128xf32>
    %c0_9 = arith.constant 0 : index
    %c0_10 = arith.constant 0 : index
    %14 = vector.load %arg5[%c0_9, %c0_10] : memref<128x128xf32, #tpu.memory_space<vmem>>, vector<128x128xf32>
    tpu.vector_store %arg5[%c0_9, %c0_10], %13 {strides = array<i32>} : memref<128x128xf32, #tpu.memory_space<vmem>>, vector<128x128xf32>,
    return
  }
  func.func @transform_0(%arg0: i32) -> (i32, i32) {
    %c0_i32 = arith.constant 0 : i32
    %c0_i32_0 = arith.constant 0 : i32
    return %arg0, %c0_i32 : i32, i32
  }
  func.func @transform_1(%arg0: i32) -> (i32, i32) {
    %c0_i32 = arith.constant 0 : i32
    %c0_i32_0 = arith.constant 0 : i32
    %c0_i32_1 = arith.constant 0 : i32
    return %c0_i32, %c0_i32_0 : i32, i32
  }
  func.func @transform_2(%arg0: i32) -> (i32, i32) {
    %c0_i32 = arith.constant 0 : i32
    %c0_i32_0 = arith.constant 0 : i32
    %c0_i32_1 = arith.constant 0 : i32
    return %c0_i32, %c0_i32_0 : i32, i32
  }
  func.func @transform_3(%arg0: i32) -> (i32, i32) {
    %c0_i32 = arith.constant 0 : i32
    %c0_i32_0 = arith.constant 0 : i32
    %c0_i32_1 = arith.constant 0 : i32
    return %c0_i32, %c0_i32_0 : i32, i32
  }
  func.func @transform_4(%arg0: i32) -> (i32, i32) {
    %c0_i32 = arith.constant 0 : i32
    %c0_i32_0 = arith.constant 0 : i32
    return %arg0, %c0_i32 : i32, i32
  }
}

</mosaic_0001>

<bundles_post_ra>
// kernel: factorized_reduce.3
= control target key start
LH: loop header
LB: loop body
LE: loop exit
PB: predicated region body
PF: predicated region fallthrough
CT: control target
= control target key end

     0   :  { %vm149_vm0 = vcmask 1043456   ;;  %vm124_vm5 = vcmask 64512   ;;  %s503_s1 = inlined_call_operand.vmem [shape: bf16[8,128], index: 1, kind: input, shape index: {}]   ;;  %s504_s0 = inlined_call_operand.vmem [shape: bf16[128,8], index: 0, kind: input, shape index: {}]   ;;  %s505_s2 = inlined_call_operand.vmem [shape: f32[1,128], index: 2, kind: input, shape index: {}]   ;;  %s506_s3 = inlined_call_operand.vmem [shape: f32[1,128], index: 3, kind: input, shape index: {}]   ;;  %s507_s4 = inlined_call_operand.vmem [shape: f32[128,128], index: 4, kind: output, shape index: {}]  }
   0x1   :  { %v83_v0 = vld [vmem:[%s503_s1] sm:$0xf]  ;;  %v20_v2 = vld [vmem:[%s504_s0 + $0x4] sm:$0xf]  ;;  %v21_v10 = vld [vmem:[%s504_s0 + $0x8] sm:$0xf] }
   0x2   :  { %v19_v1 = vld [vmem:[%s504_s0] sm:$0xf]  ;;  %363 = vmatprep.subr.msk.bf16.mxu0 %vm149_vm0, %v83_v0  ;;  %364 = vmatprep.subr.msk.bf16.mxu1 %vm149_vm0, %v83_v0  ;;  %v151_v3 = vsel %vm149_vm0, %v83_v0, 0  ;;  %vm36_vm2 = vcmp.ge.bf16.partialorder %v20_v2, 0  ;;  %v52_v5 = vmul.bf16 1009007652, %v20_v2 }
   0x3   :  { %vm35_vm1 = vcmp.ge.bf16.partialorder %v19_v1, 0  ;;  %v51_v4 = vmul.bf16 1009007652, %v19_v1  ;;  %344 = vmatpush3.bf16.msra.mxu0 %v151_v3  ;;  %362 = vmatpush3.bf16.msra.mxu1 %v151_v3  ;;  %v27_v6 = vld [vmem:[%s504_s0 + $0x20] sm:$0xf]  ;;  %vm37_vm6 = vcmp.ge.bf16.partialorder %v21_v10, 0 }
   0x4   :  { %v28_v7 = vld [vmem:[%s504_s0 + $0x24] sm:$0xf]  ;;  %vm43_vm3 = vcmp.ge.bf16.partialorder %v27_v6, 0  ;;  %v59_v9 = vmul.bf16 1009007652, %v27_v6  ;;  %v68_v11 = vsel %vm36_vm2, %v20_v2, %v52_v5 }
   0x5   :  { %v67_v8 = vsel %vm35_vm1, %v19_v1, %v51_v4  ;;  %vm44_vm4 = vcmp.ge.bf16.partialorder %v28_v7, 0  ;;  %v60_v12 = vmul.bf16 1009007652, %v28_v7  ;;  %v22_v13 = vld [vmem:[%s504_s0 + $0xc] sm:$0xf] }
   0x6   :  { %v316_v14 = vcombine.low %v67_v8, %v68_v11  ;;  %v75_v15 = vsel %vm43_vm3, %v27_v6, %v59_v9  ;;  %vm38_vm7 = vcmp.ge.bf16.partialorder %v22_v13, 0  ;;  %v53_v16 = vmul.bf16 1009007652, %v21_v10  ;;  %v29_v17 = vld [vmem:[%s504_s0 + $0x28] sm:$0xf] }
   0x7   :  { %v76_v18 = vsel %vm44_vm4, %v28_v7, %v60_v12  ;;  %v54_v19 = vmul.bf16 1009007652, %v22_v13  ;;  %v30_v20 = vld [vmem:[%s504_s0 + $0x2c] sm:$0xf]  ;;  %vm45_vm8 = vcmp.ge.bf16.partialorder %v29_v17, 0 }
   0x8   :  { %345 = vmatprep.mubr.msk.bf16.mxu0 %vm124_vm5, %v316_v14  ;;  %v320_v21 = vcombine.low %v75_v15, %v76_v18  ;;  %v69_v22 = vsel %vm37_vm6, %v21_v10, %v53_v16  ;;  %vm46_vm9 = vcmp.ge.bf16.partialorder %v30_v20, 0  ;;  %v61_v23 = vmul.bf16 1009007652, %v29_v17  ;;  %v23_v24 = vld [vmem:[%s504_s0 + $0x10] sm:$0xf] }
   0x9   :  { %v70_v25 = vsel %vm38_vm7, %v22_v13, %v54_v19  ;;  %v62_v26 = vmul.bf16 1009007652, %v30_v20  ;;  %v24_v27 = vld [vmem:[%s504_s0 + $0x14] sm:$0xf]  ;;  %vm39_vm10 = vcmp.ge.bf16.partialorder %v23_v24, 0 }
   0xa   :  { %353 = vmatprep.mubr.msk.bf16.mxu1 %vm124_vm5, %v320_v21  ;;  %v317_v28 = vcombine.low %v69_v22, %v70_v25  ;;  %v77_v29 = vsel %vm45_vm8, %v29_v17, %v61_v23  ;;  %vm40_vm11 = vcmp.ge.bf16.partialorder %v24_v27, 0  ;;  %v55_v30 = vmul.bf16 1009007652, %v23_v24  ;;  %v31_v31 = vld [vmem:[%s504_s0 + $0x30] sm:$0xf] }
   0xb   :  { %v78_v32 = vsel %vm46_vm9, %v30_v20, %v62_v26  ;;  %v56_v33 = vmul.bf16 1009007652, %v24_v27  ;;  %v32_v34 = vld [vmem:[%s504_s0 + $0x34] sm:$0xf]  ;;  %vm47_vm12 = vcmp.ge.bf16.partialorder %v31_v31, 0 }
   0xc   :  { %346 = vmatmul.mubr.msk.bf16.vlgmr.msra.gmra.mrb[0].mxu0 %vm124_vm5, %v317_v28  ;;  %v321_v35 = vcombine.low %v77_v29, %v78_v32  ;;  %v71_v36 = vsel %vm39_vm10, %v23_v24, %v55_v30  ;;  %vm48_vm13 = vcmp.ge.bf16.partialorder %v32_v34, 0  ;;  %v63_v37 = vmul.bf16 1009007652, %v31_v31  ;;  %v25_v38 = vld [vmem:[%s504_s0 + $0x18] sm:$0xf] }
   0xd   :  { %v72_v39 = vsel %vm40_vm11, %v24_v27, %v56_v33  ;;  %v64_v40 = vmul.bf16 1009007652, %v32_v34  ;;  %v26_v41 = vld [vmem:[%s504_s0 + $0x1c] sm:$0xf]  ;;  %vm41_vm14 = vcmp.ge.bf16.partialorder %v25_v38, 0 }
   0xe   :  { %354 = vmatmul.mubr.msk.bf16.vlgmr.msra.gmra.mrb[0].mxu1 %vm124_vm5, %v321_v35  ;;  %v318_v42 = vcombine.low %v71_v36, %v72_v39  ;;  %v79_v43 = vsel %vm47_vm12, %v31_v31, %v63_v37  ;;  %vm42_vm15 = vcmp.ge.bf16.partialorder %v26_v41, 0  ;;  %v57_v44 = vmul.bf16 1009007652, %v25_v38  ;;  %v33_v45 = vld [vmem:[%s504_s0 + $0x38] sm:$0xf] }
   0xf   :  { %v80_v46 = vsel %vm48_vm13, %v32_v34, %v64_v40  ;;  %v58_v47 = vmul.bf16 1009007652, %v26_v41  ;;  %v34_v48 = vld [vmem:[%s504_s0 + $0x3c] sm:$0xf]  ;;  %vm49_vm0 = vcmp.ge.bf16.partialorder %v33_v45, 0 }
  0x10   :  { %349 = vmatprep.mubr.msk.bf16.mxu0 %vm124_vm5, %v318_v42  ;;  %v322_v49 = vcombine.low %v79_v43, %v80_v46  ;;  %v73_v50 = vsel %vm41_vm14, %v25_v38, %v57_v44  ;;  %vm50_vm1 = vcmp.ge.bf16.partialorder %v34_v48, 0  ;;  %v65_v51 = vmul.bf16 1009007652, %v33_v45  ;;  %v332_v58 = vld [vmem:[%s505_s2] ss:$0 sm:$0xff] }
  0x11   :  { %v74_v52 = vsel %vm42_vm15, %v26_v41, %v58_v47  ;;  %v66_v53 = vmul.bf16 1009007652, %v34_v48  ;;  %v333_v60 = vld [vmem:[%s506_s3] ss:$0 sm:$0xff] }
  0x12   :  { %357 = vmatprep.mubr.msk.bf16.mxu1 %vm124_vm5, %v322_v49  ;;  %v319_v54 = vcombine.low %v73_v50, %v74_v52  ;;  %v81_v55 = vsel %vm49_vm0, %v33_v45, %v65_v51 }
  0x13   :  { %v82_v56 = vsel %vm50_vm1, %v34_v48, %v66_v53 }
  0x14   :  { %350 = vmatmul.mubr.msk.bf16.gmra.mrb[4].mxu0 %vm124_vm5, %v319_v54  ;;  %v323_v57 = vcombine.low %v81_v55, %v82_v56 }
  0x16   :  { %358 = vmatmul.mubr.msk.bf16.gmra.mrb[4].mxu1 %vm124_vm5, %v323_v57 }
  0xdf   :  { %v347_v59 = vpop.f32.mrb[0].mxu0 }
  0xe0   :  { %v259_v61 = vmul.f32 %v347_v59, %v332_v58  ;;  %v187_v62 = vpop.f32.mrb[1].mxu0 }
  0xe1   :  { %v355_v63 = vpop.f32.mrb[0].mxu1  ;;  %v257_v0 = vmul.f32 %v332_v58, %v187_v62  ;;  %v348_v1 = vpop.f32.mrb[2].mxu0 }
  0xe2   :  { %v282_v2 = vadd.f32 %v333_v60, %v259_v61  ;;  %v267_v3 = vmul.f32 %v355_v63, %v332_v58  ;;  %v219_v4 = vpop.f32.mrb[1].mxu1  ;;  %v260_v5 = vmul.f32 %v348_v1, %v332_v58  ;;  %v190_v6 = vpop.f32.mrb[3].mxu0 }
  0xe3   :  { %v280_v7 = vadd.f32 %v333_v60, %v257_v0  ;;  %v265_v8 = vmul.f32 %v332_v58, %v219_v4  ;;  %v356_v9 = vpop.f32.mrb[2].mxu1  ;;  %v258_v10 = vmul.f32 %v332_v58, %v190_v6 }
  0xe4   :  { %298 = vst [vmem:[%s507_s4 + $0x10] sm:$0xff] %v282_v2  ;;  %v290_v11 = vadd.f32 %v333_v60, %v267_v3  ;;  %v283_v12 = vadd.f32 %v333_v60, %v260_v5  ;;  %v268_v13 = vmul.f32 %v356_v9, %v332_v58  ;;  %v222_v14 = vpop.f32.mrb[3].mxu1 }
  0xe5   :  { %296 = vst [vmem:[%s507_s4] sm:$0xff] %v280_v7  ;;  %v288_v15 = vadd.f32 %v333_v60, %v265_v8  ;;  %v281_v16 = vadd.f32 %v333_v60, %v258_v10  ;;  %v266_v17 = vmul.f32 %v332_v58, %v222_v14 }
  0xe6   :  { %306 = vst [vmem:[%s507_s4 + $0x50] sm:$0xff] %v290_v11  ;;  %299 = vst [vmem:[%s507_s4 + $0x18] sm:$0xff] %v283_v12  ;;  %v291_v18 = vadd.f32 %v333_v60, %v268_v13 }
  0xe7   :  { %304 = vst [vmem:[%s507_s4 + $0x40] sm:$0xff] %v288_v15  ;;  %297 = vst [vmem:[%s507_s4 + $0x8] sm:$0xff] %v281_v16  ;;  %v289_v19 = vadd.f32 %v333_v60, %v266_v17  ;;  %v351_v20 = vpop.f32.mrb[4].mxu0 }
  0xe8   :  { %307 = vst [vmem:[%s507_s4 + $0x58] sm:$0xff] %v291_v18  ;;  %v263_v21 = vmul.f32 %v351_v20, %v332_v58  ;;  %v203_v22 = vpop.f32.mrb[5].mxu0 }
  0xe9   :  { %305 = vst [vmem:[%s507_s4 + $0x48] sm:$0xff] %v289_v19  ;;  %v359_v23 = vpop.f32.mrb[4].mxu1  ;;  %v261_v24 = vmul.f32 %v332_v58, %v203_v22  ;;  %v352_v25 = vpop.f32.mrb[6].mxu0 }
  0xea   :  { %v286_v26 = vadd.f32 %v333_v60, %v263_v21  ;;  %v271_v27 = vmul.f32 %v359_v23, %v332_v58  ;;  %v235_v28 = vpop.f32.mrb[5].mxu1  ;;  %v264_v29 = vmul.f32 %v352_v25, %v332_v58  ;;  %v206_v30 = vpop.f32.mrb[7].mxu0 }
  0xeb   :  { %v284_v31 = vadd.f32 %v333_v60, %v261_v24  ;;  %v269_v32 = vmul.f32 %v332_v58, %v235_v28  ;;  %v360_v33 = vpop.f32.mrb[6].mxu1  ;;  %v262_v34 = vmul.f32 %v332_v58, %v206_v30 }
  0xec   :  { %302 = vst [vmem:[%s507_s4 + $0x30] sm:$0xff] %v286_v26  ;;  %v294_v35 = vadd.f32 %v333_v60, %v271_v27  ;;  %v287_v36 = vadd.f32 %v333_v60, %v264_v29  ;;  %v272_v37 = vmul.f32 %v360_v33, %v332_v58  ;;  %v238_v38 = vpop.f32.mrb[7].mxu1 }
  0xed   :  { %300 = vst [vmem:[%s507_s4 + $0x20] sm:$0xff] %v284_v31  ;;  %v292_v39 = vadd.f32 %v333_v60, %v269_v32  ;;  %v285_v40 = vadd.f32 %v333_v60, %v262_v34  ;;  %v270_v41 = vmul.f32 %v332_v58, %v238_v38 }
  0xee   :  { %310 = vst [vmem:[%s507_s4 + $0x70] sm:$0xff] %v294_v35  ;;  %303 = vst [vmem:[%s507_s4 + $0x38] sm:$0xff] %v287_v36  ;;  %v295_v42 = vadd.f32 %v333_v60, %v272_v37 }
  0xef   :  { %308 = vst [vmem:[%s507_s4 + $0x60] sm:$0xff] %v292_v39  ;;  %301 = vst [vmem:[%s507_s4 + $0x28] sm:$0xff] %v285_v40  ;;  %v293_v43 = vadd.f32 %v333_v60, %v270_v41 }
  0xf0   :  { %311 = vst [vmem:[%s507_s4 + $0x78] sm:$0xff] %v295_v42 }
  0xf1   :  { %309 = vst [vmem:[%s507_s4 + $0x68] sm:$0xff] %v293_v43 }

// kernel: factorized_reduce.2
= control target key start
LH: loop header
LB: loop body
LE: loop exit
PB: predicated region body
PF: predicated region fallthrough
CT: control target
= control target key end

     0   :  { %vm143_vm0 = vcmask 1043456   ;;  %vm118_vm5 = vcmask 64512   ;;  %s435_s1 = inlined_call_operand.vmem [shape: bf16[8,128], index: 1, kind: input, shape index: {}]   ;;  %s436_s0 = inlined_call_operand.vmem [shape: bf16[128,8], index: 0, kind: input, shape index: {}]   ;;  %s437_s2 = inlined_call_operand.vmem [shape: f32[8,128], index: 2, kind: output, shape index: {}]  }
   0x1   :  { %v77_v0 = vld [vmem:[%s435_s1] sm:$0xf]  ;;  %v14_v2 = vld [vmem:[%s436_s0 + $0x4] sm:$0xf]  ;;  %v15_v6 = vld [vmem:[%s436_s0 + $0x8] sm:$0xf] }
   0x2   :  { %v13_v1 = vld [vmem:[%s436_s0] sm:$0xf]  ;;  %353 = vmatprep.subr.msk.bf16.mxu0 %vm143_vm0, %v77_v0  ;;  %v145_v3 = vsel %vm143_vm0, %v77_v0, 0  ;;  %vm30_vm2 = vcmp.ge.bf16.partialorder %v14_v2, 0  ;;  %354 = vmatprep.subr.msk.bf16.mxu1 %vm143_vm0, %v77_v0  ;;  %v46_v5 = vmul.bf16 1009007652, %v14_v2 }
   0x3   :  { %vm29_vm1 = vcmp.ge.bf16.partialorder %v13_v1, 0  ;;  %v45_v4 = vmul.bf16 1009007652, %v13_v1  ;;  %334 = vmatpush3.bf16.msra.mxu0 %v145_v3  ;;  %v16_v7 = vld [vmem:[%s436_s0 + $0xc] sm:$0xf]  ;;  %352 = vmatpush3.bf16.msra.mxu1 %v145_v3  ;;  %vm31_vm3 = vcmp.ge.bf16.partialorder %v15_v6, 0 }
   0x4   :  { %vm32_vm4 = vcmp.ge.bf16.partialorder %v16_v7, 0  ;;  %v47_v9 = vmul.bf16 1009007652, %v15_v6  ;;  %v17_v10 = vld [vmem:[%s436_s0 + $0x10] sm:$0xf]  ;;  %v62_v11 = vsel %vm30_vm2, %v14_v2, %v46_v5 }
   0x5   :  { %v61_v8 = vsel %vm29_vm1, %v13_v1, %v45_v4  ;;  %v48_v12 = vmul.bf16 1009007652, %v16_v7  ;;  %v18_v13 = vld [vmem:[%s436_s0 + $0x14] sm:$0xf]  ;;  %vm33_vm6 = vcmp.ge.bf16.partialorder %v17_v10, 0 }
   0x6   :  { %v308_v14 = vcombine.low %v61_v8, %v62_v11  ;;  %v63_v15 = vsel %vm31_vm3, %v15_v6, %v47_v9  ;;  %vm34_vm7 = vcmp.ge.bf16.partialorder %v18_v13, 0  ;;  %v49_v16 = vmul.bf16 1009007652, %v17_v10  ;;  %v19_v17 = vld [vmem:[%s436_s0 + $0x18] sm:$0xf] }
   0x7   :  { %v64_v18 = vsel %vm32_vm4, %v16_v7, %v48_v12  ;;  %v50_v19 = vmul.bf16 1009007652, %v18_v13  ;;  %v20_v20 = vld [vmem:[%s436_s0 + $0x1c] sm:$0xf]  ;;  %vm35_vm8 = vcmp.ge.bf16.partialorder %v19_v17, 0 }
   0x8   :  { %335 = vmatprep.mubr.msk.bf16.mxu0 %vm118_vm5, %v308_v14  ;;  %v309_v21 = vcombine.low %v63_v15, %v64_v18  ;;  %v65_v22 = vsel %vm33_vm6, %v17_v10, %v49_v16  ;;  %vm36_vm9 = vcmp.ge.bf16.partialorder %v20_v20, 0  ;;  %v51_v23 = vmul.bf16 1009007652, %v19_v17  ;;  %v21_v24 = vld [vmem:[%s436_s0 + $0x20] sm:$0xf] }
   0x9   :  { %v66_v25 = vsel %vm34_vm7, %v18_v13, %v50_v19  ;;  %v52_v26 = vmul.bf16 1009007652, %v20_v20  ;;  %v22_v27 = vld [vmem:[%s436_s0 + $0x24] sm:$0xf]  ;;  %vm37_vm10 = vcmp.ge.bf16.partialorder %v21_v24, 0 }
   0xa   :  { %336 = vmatmul.mubr.msk.bf16.vlgmr.msra.gmra.mrb[0].mxu0 %vm118_vm5, %v309_v21  ;;  %v310_v28 = vcombine.low %v65_v22, %v66_v25  ;;  %v67_v29 = vsel %vm35_vm8, %v19_v17, %v51_v23  ;;  %vm38_vm11 = vcmp.ge.bf16.partialorder %v22_v27, 0  ;;  %v53_v30 = vmul.bf16 1009007652, %v21_v24  ;;  %v23_v31 = vld [vmem:[%s436_s0 + $0x28] sm:$0xf] }
   0xb   :  { %v68_v32 = vsel %vm36_vm9, %v20_v20, %v52_v26  ;;  %v54_v33 = vmul.bf16 1009007652, %v22_v27  ;;  %v24_v34 = vld [vmem:[%s436_s0 + $0x2c] sm:$0xf]  ;;  %vm39_vm12 = vcmp.ge.bf16.partialorder %v23_v31, 0 }
   0xc   :  { %339 = vmatprep.mubr.msk.bf16.mxu0 %vm118_vm5, %v310_v28  ;;  %v69_v35 = vsel %vm37_vm10, %v21_v24, %v53_v30  ;;  %vm40_vm13 = vcmp.ge.bf16.partialorder %v24_v34, 0  ;;  %v55_v36 = vmul.bf16 1009007652, %v23_v31  ;;  %v25_v37 = vld [vmem:[%s436_s0 + $0x30] sm:$0xf]  ;;  %v311_v38 = vcombine.low %v67_v29, %v68_v32 }
   0xd   :  { %v70_v39 = vsel %vm38_vm11, %v22_v27, %v54_v33  ;;  %v56_v40 = vmul.bf16 1009007652, %v24_v34  ;;  %v26_v41 = vld [vmem:[%s436_s0 + $0x34] sm:$0xf]  ;;  %vm41_vm14 = vcmp.ge.bf16.partialorder %v25_v37, 0 }
   0xe   :  { %v312_v42 = vcombine.low %v69_v35, %v70_v39  ;;  %v71_v43 = vsel %vm39_vm12, %v23_v31, %v55_v36  ;;  %vm42_vm15 = vcmp.ge.bf16.partialorder %v26_v41, 0  ;;  %v57_v44 = vmul.bf16 1009007652, %v25_v37  ;;  %v27_v45 = vld [vmem:[%s436_s0 + $0x38] sm:$0xf] }
   0xf   :  { %v72_v46 = vsel %vm40_vm13, %v24_v34, %v56_v40  ;;  %v58_v47 = vmul.bf16 1009007652, %v26_v41  ;;  %v28_v48 = vld [vmem:[%s436_s0 + $0x3c] sm:$0xf]  ;;  %vm43_vm0 = vcmp.ge.bf16.partialorder %v27_v45, 0 }
  0x10   :  { %343 = vmatprep.mubr.msk.bf16.mxu1 %vm118_vm5, %v312_v42  ;;  %v313_v49 = vcombine.low %v71_v43, %v72_v46  ;;  %v73_v50 = vsel %vm41_vm14, %v25_v37, %v57_v44  ;;  %vm44_vm1 = vcmp.ge.bf16.partialorder %v28_v48, 0  ;;  %v59_v51 = vmul.bf16 1009007652, %v27_v45 }
  0x11   :  { %v74_v52 = vsel %vm42_vm15, %v26_v41, %v58_v47  ;;  %v60_v53 = vmul.bf16 1009007652, %v28_v48 }
  0x12   :  { %340 = vmatmul.mubr.msk.bf16.gmra.mrb[4].mxu0 %vm118_vm5, %v311_v38  ;;  %344 = vmatmul.mubr.msk.bf16.vlgmr.msra.gmra.mrb[0].mxu1 %vm118_vm5, %v313_v49  ;;  %v314_v54 = vcombine.low %v73_v50, %v74_v52  ;;  %v75_v55 = vsel %vm43_vm0, %v27_v45, %v59_v51 }
  0x13   :  { %v76_v56 = vsel %vm44_vm1, %v28_v48, %v60_v53 }
  0x14   :  { %347 = vmatprep.mubr.msk.bf16.mxu1 %vm118_vm5, %v314_v54  ;;  %v315_v57 = vcombine.low %v75_v55, %v76_v56 }
  0x1a   :  { %348 = vmatmul.mubr.msk.bf16.gmra.mrb[4].mxu1 %vm118_vm5, %v315_v57 }
  0xdd   :  { %v337_v58 = vpop.f32.mrb[0].mxu0 }
  0xde   :  { %v181_v59 = vpop.f32.mrb[1].mxu0  ;;  %v268_v1 = vmul.f32 %v337_v58, %v337_v58 }
  0xdf   :  { %v338_v60 = vpop.f32.mrb[2].mxu0  ;;  %v266_v62 = vmul.f32 %v181_v59, %v181_v59 }
  0xe0   :  { %v184_v61 = vpop.f32.mrb[3].mxu0  ;;  %v269_v4 = vmul.f32 %v338_v60, %v338_v60 }
  0xe1   :  { %v244_v63 = vadd.f32 %v184_v61, %v181_v59  ;;  %v267_v0 = vmul.f32 %v184_v61, %v184_v61 }
  0xe3   :  { %v245_v2 = vadd.f32 %v337_v58, %v244_v63  ;;  %v282_v3 = vadd.f32 %v267_v0, %v266_v62 }
  0xe5   :  { %v283_v5 = vadd.f32 %v282_v3, %v268_v1  ;;  %v341_v6 = vpop.f32.mrb[4].mxu0  ;;  %v246_v7 = vadd.f32 %v338_v60, %v245_v2  ;;  %v345_v8 = vpop.f32.mrb[0].mxu1 }
  0xe6   :  { %v197_v9 = vpop.f32.mrb[5].mxu0  ;;  %v213_v10 = vpop.f32.mrb[1].mxu1  ;;  %v272_v21 = vmul.f32 %v341_v6, %v341_v6  ;;  %v276_v37 = vmul.f32 %v345_v8, %v345_v8 }
  0xe7   :  { %v247_v11 = vadd.f32 %v246_v7, %v197_v9  ;;  %v270_v12 = vmul.f32 %v197_v9, %v197_v9  ;;  %v284_v13 = vadd.f32 %v283_v5, %v269_v4  ;;  %v342_v14 = vpop.f32.mrb[6].mxu0  ;;  %v346_v15 = vpop.f32.mrb[2].mxu1  ;;  %v274_v27 = vmul.f32 %v213_v10, %v213_v10 }
  0xe8   :  { %v200_v16 = vpop.f32.mrb[7].mxu0  ;;  %v216_v17 = vpop.f32.mrb[3].mxu1  ;;  %v273_v24 = vmul.f32 %v342_v14, %v342_v14  ;;  %v277_v40 = vmul.f32 %v346_v15, %v346_v15 }
  0xe9   :  { %v285_v18 = vadd.f32 %v284_v13, %v270_v12  ;;  %v248_v19 = vadd.f32 %v247_v11, %v200_v16  ;;  %v271_v20 = vmul.f32 %v200_v16, %v200_v16  ;;  %v275_v36 = vmul.f32 %v216_v17, %v216_v17 }
  0xeb   :  { %v249_v22 = vadd.f32 %v341_v6, %v248_v19  ;;  %v286_v23 = vadd.f32 %v285_v18, %v271_v20 }
  0xed   :  { %v287_v25 = vadd.f32 %v286_v23, %v272_v21  ;;  %v250_v26 = vadd.f32 %v342_v14, %v249_v22  ;;  %v349_v28 = vpop.f32.mrb[4].mxu1 }
  0xee   :  { %v229_v29 = vpop.f32.mrb[5].mxu1  ;;  %v280_v49 = vmul.f32 %v349_v28, %v349_v28 }
  0xef   :  { %v251_v30 = vadd.f32 %v250_v26, %v213_v10  ;;  %v288_v31 = vadd.f32 %v287_v25, %v273_v24  ;;  %v350_v32 = vpop.f32.mrb[6].mxu1  ;;  %v278_v43 = vmul.f32 %v229_v29, %v229_v29 }
  0xf0   :  { %v232_v33 = vpop.f32.mrb[7].mxu1  ;;  %v281_v52 = vmul.f32 %v350_v32, %v350_v32 }
  0xf1   :  { %v289_v34 = vadd.f32 %v288_v31, %v274_v27  ;;  %v252_v35 = vadd.f32 %v251_v30, %v216_v17  ;;  %v279_v48 = vmul.f32 %v232_v33, %v232_v33 }
  0xf3   :  { %v253_v38 = vadd.f32 %v345_v8, %v252_v35  ;;  %v290_v39 = vadd.f32 %v289_v34, %v275_v36 }
  0xf5   :  { %v291_v41 = vadd.f32 %v290_v39, %v276_v37  ;;  %v254_v42 = vadd.f32 %v346_v15, %v253_v38 }
  0xf7   :  { %v255_v44 = vadd.f32 %v254_v42, %v229_v29  ;;  %v292_v45 = vadd.f32 %v291_v41, %v277_v40 }
  0xf9   :  { %v293_v46 = vadd.f32 %v292_v45, %v278_v43  ;;  %v256_v47 = vadd.f32 %v255_v44, %v232_v33 }
  0xfb   :  { %v257_v50 = vadd.f32 %v349_v28, %v256_v47  ;;  %v294_v51 = vadd.f32 %v293_v46, %v279_v48 }
  0xfd   :  { %v258_v53 = vadd.f32 %v350_v32, %v257_v50  ;;  %v295_v54 = vadd.f32 %v294_v51, %v280_v49 }
  0xff   :  { %v259_v55 = vrot.slane %v258_v53, 4  ;;  %v296_v56 = vadd.f32 %v295_v54, %v281_v52 }
 0x101   :  { %v260_v57 = vadd.f32 %v259_v55, %v258_v53  ;;  %v297_v58 = vrot.slane %v296_v56, 4 }
 0x103   :  { %v261_v59 = vrot.slane %v260_v57, 2  ;;  %v298_v60 = vadd.f32 %v297_v58, %v296_v56 }
 0x105   :  { %v262_v61 = vadd.f32 %v261_v59, %v260_v57  ;;  %v299_v62 = vrot.slane %v298_v60, 2 }
 0x107   :  { %v263_v63 = vrot.slane %v262_v61, 1  ;;  %v300_v0 = vadd.f32 %v299_v62, %v298_v60 }
 0x109   :  { %v264_v1 = vadd.f32 %v263_v63, %v262_v61  ;;  %v301_v2 = vrot.slane %v300_v0, 1 }
 0x10b   :  { %265 = vst [vmem:[%s437_s2] sm:$0x1] %v264_v1  ;;  %v302_v3 = vadd.f32 %v301_v2, %v300_v0 }
 0x10d   :  { %303 = vst [vmem:[%s437_s2 + $0x1] sm:$0x1] %v302_v3 }

</bundles_post_ra>
